<compile_context>
chip_gen: v7x
topology: tpu7x:2x2x1
jax: 0.10.0
libtpu: 0.0.40
codegen_flags: <defaults>
</compile_context>

<pallas_src>
import jax
import jax.numpy as jnp
from jax.experimental import pallas as pl
from jax.experimental.pallas import tpu as pltpu

K_IN = 28 * 28          # 784
H1 = 512
H2 = 256


def _round_up(x, m):
    return ((x + m - 1) // m) * m


def _leaky_relu(x, alpha=0.2):
    return jnp.where(x > 0, x, alpha * x)


def _select_tb(batch):
    """Batch-tile selection: big tiles amortize the ~0.35us/grid-step overhead;
    for large batches keep >= 2 grid steps so v7x can shard across both TCs."""
    bp8 = _round_up(max(batch, 8), 8)
    if bp8 <= 512:
        return bp8                                        # single tile
    return min(1024, _round_up(pl.cdiv(bp8, 2), 256))     # >= 2 tiles, <= 1024 rows


def discriminator_kernel(x_ref, w1_ref, b1_ref, w2_ref, b2_ref, w3t_ref, b3_ref, o_ref):
    # Streamed f32 x tile -> bf16 for the MXU (the cast is VPU filler under the matmul).
    xb = x_ref[...].astype(jnp.bfloat16)                                    # (TB, 784)

    # Layer 1: (TB, 784) @ (784, 512), bf16 in / f32 accumulate, +bias, LeakyReLU.
    h1 = jnp.dot(xb, w1_ref[...], preferred_element_type=jnp.float32)
    h1 = _leaky_relu(h1 + b1_ref[...])
    # Dropout(0.3) -> identity (eval mode)

    # Layer 2: (TB, 512) @ (512, 256), bf16 in / f32 accumulate, +bias, LeakyReLU.
    h2 = jnp.dot(h1.astype(jnp.bfloat16), w2_ref[...],
                 preferred_element_type=jnp.float32)
    h2 = _leaky_relu(h2 + b2_ref[...])
    # Dropout(0.3) -> identity (eval mode)

    # Layer 3: N=1 head as a VPU/XLU reduction (avoids a 1-column MXU push).
    logits = jnp.sum(h2 * w3t_ref[...], axis=-1, keepdims=True) + b3_ref[...]   # (TB, 1)

    # Lane-dense epilogue: transpose to (1, TB) BEFORE sigmoid so the EUP runs on
    # full vregs and the store is an unmasked, lane-dense vst.
    o_ref[...] = jax.nn.sigmoid(logits.T).reshape(o_ref.shape)               # (1, 1, TB)


def discriminator_forward(x, params, *, tb=None):
    """x: (B, 1, 28, 28) or (B, 784). Returns (B, 1) float32 (eval-mode forward)."""
    B = x.shape[0]
    w1, b1, w2, b2, w3, b3 = params

    # Flatten; keep x in f32 (no padded-bf16 staging pass) — the kernel casts.
    x2d = x.reshape(B, K_IN).astype(jnp.float32)

    if tb is None:
        tb = _select_tb(B)
    n_blocks = pl.cdiv(B, tb)
    Bp = n_blocks * tb
    if Bp != B:
        x2d = jnp.pad(x2d, ((0, Bp - B), (0, 0)))

    # Weights staged once: bf16 for the MXU operands, f32 for bias / head / epilogue.
    w1b = w1.astype(jnp.bfloat16)     # (784, 512)
    w2b = w2.astype(jnp.bfloat16)     # (512, 256)
    w3t = w3.T.astype(jnp.float32)    # (1, 256)
    b1f = b1.astype(jnp.float32)      # (1, 512)
    b2f = b2.astype(jnp.float32)      # (1, 256)
    b3f = b3.astype(jnp.float32)      # (1, 1)

    flops = 2 * Bp * (K_IN * H1 + H1 * H2 + H2)
    bytes_accessed = (
        Bp * K_IN * 4 + Bp * 4                       # x in (f32) + scores out
        + (w1b.size + w2b.size) * 2                  # bf16 weights
        + (b1f.size + b2f.size + w3t.size + b3f.size) * 4
    )
    cost = pl.CostEstimate(flops=flops, transcendentals=Bp, bytes_accessed=bytes_accessed)

    out = pl.pallas_call(
        discriminator_kernel,
        out_shape=jax.ShapeDtypeStruct((n_blocks, 1, tb), jnp.float32),
        grid=(n_blocks,),
        in_specs=[
            pl.BlockSpec((tb, K_IN), lambda i: (i, 0)),   # x tile (streamed, pipelined)
            pl.BlockSpec((K_IN, H1), lambda i: (0, 0)),   # w1 (VMEM-resident)
            pl.BlockSpec((1, H1), lambda i: (0, 0)),      # b1
            pl.BlockSpec((H1, H2), lambda i: (0, 0)),     # w2
            pl.BlockSpec((1, H2), lambda i: (0, 0)),      # b2
            pl.BlockSpec((1, H2), lambda i: (0, 0)),      # w3^T
            pl.BlockSpec((1, 1), lambda i: (0, 0)),       # b3
        ],
        out_specs=pl.BlockSpec((1, 1, tb), lambda i: (i, 0, 0)),   # lane-dense scores
        compiler_params=pltpu.CompilerParams(
            dimension_semantics=("parallel",),
            vmem_limit_bytes=32 * 1024 * 1024,   # raise v5e's 16 MiB default scoped limit
        ),
        cost_estimate=cost,
    )(x2d, w1b, b1f, w2b, b2f, w3t, b3f)

    return out.reshape(Bp, 1)[:B]


def init_params(key):
    """Deterministic init mimicking PyTorch nn.Linear default: U(-1/sqrt(fan_in), +)."""
    dims = [(K_IN, H1), (H1, H2), (H2, 1)]
    params = []
    for fan_in, fan_out in dims:
        kw, kb, key = jax.random.split(key, 3)
        bound = 1.0 / jnp.sqrt(jnp.float32(fan_in))
        w = jax.random.uniform(kw, (fan_in, fan_out), jnp.float32, -bound, bound)
        b = jax.random.uniform(kb, (1, fan_out), jnp.float32, -bound, bound)
        params += [w, b]
    return tuple(params)


def reference_forward(x, params):
    """Pure f32 reference of the eval-mode forward."""
    B = x.shape[0]
    x2d = x.reshape(B, K_IN).astype(jnp.float32)
    w1, b1, w2, b2, w3, b3 = params
    h1 = _leaky_relu(x2d @ w1 + b1)
    h2 = _leaky_relu(h1 @ w2 + b2)
    return jax.nn.sigmoid(h2 @ w3 + b3)


if __name__ == "__main__":
    key = jax.random.PRNGKey(0)
    k_x, k_x2, k_p = jax.random.split(key, 3)
    params = init_params(k_p)

    # Small batch of MNIST-shaped inputs (B, 1, 28, 28): single-tile path.
    B = 8
    x = jax.random.normal(k_x, (B, 1, 28, 28), jnp.float32)
    out = jax.block_until_ready(discriminator_forward(x, params))
    ref = reference_forward(x, params)
    assert out.shape == (B, 1), out.shape
    # bf16 MXU inputs with f32 accumulation vs pure f32 reference: ~1e-3 level
    # differences expected; 1e-2 tolerance is plenty for a discriminator score.
    assert jnp.allclose(out, ref, atol=1e-2, rtol=1e-2), "mismatch vs reference (B=8)"

    # Multi-tile path with batch padding (exercises grid > 1 and lane-dense blocks).
    B2 = 300
    x2 = jax.random.normal(k_x2, (B2, 1, 28, 28), jnp.float32)
    out2 = jax.block_until_ready(discriminator_forward(x2, params, tb=128))
    ref2 = reference_forward(x2, params)
    assert out2.shape == (B2, 1), out2.shape
    assert jnp.allclose(out2, ref2, atol=1e-2, rtol=1e-2), "mismatch vs reference (B=300)"

    print("KERNEL_OK")
</pallas_src>

<mosaic_0001>
module attributes {stable_mosaic.version = 11 : i64} {
  func.func @discriminator_kernel(%arg0: i32, %arg1: memref<8x784xf32, #tpu.memory_space<vmem>>, %arg2: memref<784x512xbf16, #tpu.memory_space<vmem>>, %arg3: memref<1x512xf32, #tpu.memory_space<vmem>>, %arg4: memref<512x256xbf16, #tpu.memory_space<vmem>>, %arg5: memref<1x256xf32, #tpu.memory_space<vmem>>, %arg6: memref<1x256xf32, #tpu.memory_space<vmem>>, %arg7: memref<1x1xf32, #tpu.memory_space<vmem>>, %arg8: memref<1x1x8xf32, #tpu.memory_space<vmem>>) attributes {dimension_semantics = [#tpu.dimension_semantics<parallel>], iteration_bounds = array<i64: 1>, scalar_prefetch = 0 : i64, scratch_operands = 0 : i64, tpu.core_type = #tpu.core_type<tc>, window_params = [{transform_indices = @transform_0, window_bounds = array<i64: 8, 784>}, {pipeline_mode = #tpu.pipeline_mode<synchronous>, transform_indices = @transform_1, window_bounds = array<i64: 784, 512>}, {pipeline_mode = #tpu.pipeline_mode<synchronous>, transform_indices = @transform_2, window_bounds = array<i64: 1, 512>}, {pipeline_mode = #tpu.pipeline_mode<synchronous>, transform_indices = @transform_3, window_bounds = array<i64: 512, 256>}, {pipeline_mode = #tpu.pipeline_mode<synchronous>, transform_indices = @transform_4, window_bounds = array<i64: 1, 256>}, {pipeline_mode = #tpu.pipeline_mode<synchronous>, transform_indices = @transform_5, window_bounds = array<i64: 1, 256>}, {pipeline_mode = #tpu.pipeline_mode<synchronous>, transform_indices = @transform_6, window_bounds = array<i64: 1, 1>}, {transform_indices = @transform_7, window_bounds = array<i64: 1, 1, 8>}]} {
    %c0 = arith.constant 0 : index
    %c0_0 = arith.constant 0 : index
    %0 = vector.load %arg1[%c0, %c0_0] : memref<8x784xf32, #tpu.memory_space<vmem>>, vector<8x784xf32>
    %1 = arith.truncf %0 : vector<8x784xf32> to vector<8x784xbf16>
    %c0_1 = arith.constant 0 : index
    %c0_2 = arith.constant 0 : index
    %2 = vector.load %arg2[%c0_1, %c0_2] : memref<784x512xbf16, #tpu.memory_space<vmem>>, vector<784x512xbf16>
    %cst = arith.constant dense<0.000000e+00> : vector<8x512xf32>
    %3 = tpu.matmul %1, %2, %cst {dimension_numbers = #tpu.dot_dimension_numbers<[1], [0], [0], [1], [0, 0, 1, 1], [], []>} : vector<8x784xbf16>, vector<784x512xbf16>, vector<8x512xf32> -> vector<8x512xf32>
    %c0_3 = arith.constant 0 : index
    %c0_4 = arith.constant 0 : index
    %4 = vector.load %arg3[%c0_3, %c0_4] : memref<1x512xf32, #tpu.memory_space<vmem>>, vector<1x512xf32>
    %5 = vector.broadcast %4 : vector<1x512xf32> to vector<8x512xf32>
    %6 = arith.addf %3, %5 : vector<8x512xf32>
    %cst_5 = arith.constant 0.000000e+00 : f32
    %7 = vector.broadcast %cst_5 : f32 to vector<8x512xf32>
    %8 = arith.cmpf ogt, %6, %7 : vector<8x512xf32>
    %cst_6 = arith.constant 2.000000e-01 : f32
    %9 = vector.broadcast %cst_6 : f32 to vector<8x512xf32>
    %10 = arith.mulf %9, %6 : vector<8x512xf32>
    %11 = arith.select %8, %6, %10 : vector<8x512xi1>, vector<8x512xf32>
    %12 = arith.truncf %11 : vector<8x512xf32> to vector<8x512xbf16>
    %c0_7 = arith.constant 0 : index
    %c0_8 = arith.constant 0 : index
    %13 = vector.load %arg4[%c0_7, %c0_8] : memref<512x256xbf16, #tpu.memory_space<vmem>>, vector<512x256xbf16>
    %cst_9 = arith.constant dense<0.000000e+00> : vector<8x256xf32>
    %14 = tpu.matmul %12, %13, %cst_9 {dimension_numbers = #tpu.dot_dimension_numbers<[1], [0], [0], [1], [0, 0, 1, 1], [], []>} : vector<8x512xbf16>, vector<512x256xbf16>, vector<8x256xf32> -> vector<8x256xf32>
    %c0_10 = arith.constant 0 : index
    %c0_11 = arith.constant 0 : index
    %15 = vector.load %arg5[%c0_10, %c0_11] : memref<1x256xf32, #tpu.memory_space<vmem>>, vector<1x256xf32>
    %16 = vector.broadcast %15 : vector<1x256xf32> to vector<8x256xf32>
    %17 = arith.addf %14, %16 : vector<8x256xf32>
    %cst_12 = arith.constant 0.000000e+00 : f32
    %18 = vector.broadcast %cst_12 : f32 to vector<8x256xf32>
    %19 = arith.cmpf ogt, %17, %18 : vector<8x256xf32>
    %cst_13 = arith.constant 2.000000e-01 : f32
    %20 = vector.broadcast %cst_13 : f32 to vector<8x256xf32>
    %21 = arith.mulf %20, %17 : vector<8x256xf32>
    %22 = arith.select %19, %17, %21 : vector<8x256xi1>, vector<8x256xf32>
    %c0_14 = arith.constant 0 : index
    %c0_15 = arith.constant 0 : index
    %23 = vector.load %arg6[%c0_14, %c0_15] : memref<1x256xf32, #tpu.memory_space<vmem>>, vector<1x256xf32>
    %24 = vector.broadcast %23 : vector<1x256xf32> to vector<8x256xf32>
    %25 = arith.mulf %22, %24 : vector<8x256xf32>
    %cst_16 = arith.constant dense<0.000000e+00> : vector<8xf32>
    %26 = vector.multi_reduction <add>, %25, %cst_16 [1] : vector<8x256xf32> to vector<8xf32>
    %27 = vector.shape_cast %26 : vector<8xf32> to vector<8x1xf32>
    %c0_17 = arith.constant 0 : index
    %c0_18 = arith.constant 0 : index
    %28 = vector.load %arg7[%c0_17, %c0_18] : memref<1x1xf32, #tpu.memory_space<vmem>>, vector<1x1xf32>
    %29 = vector.broadcast %28 : vector<1x1xf32> to vector<8x1xf32>
    %30 = arith.addf %27, %29 : vector<8x1xf32>
    %31 = tpu.transpose %30, [1, 0] : vector<8x1xf32> -> vector<1x8xf32>
    %32 = arith.negf %31 : vector<1x8xf32>
    %33 = math.exp %32 : vector<1x8xf32>
    %cst_19 = arith.constant 1.000000e+00 : f32
    %34 = vector.broadcast %cst_19 : f32 to vector<1x8xf32>
    %35 = arith.addf %34, %33 : vector<1x8xf32>
    %36 = arith.divf %34, %35 : vector<1x8xf32>
    %37 = vector.shape_cast %36 : vector<1x8xf32> to vector<1x1x8xf32>
    %c0_20 = arith.constant 0 : index
    %c0_21 = arith.constant 0 : index
    %c0_22 = arith.constant 0 : index
    %38 = vector.load %arg8[%c0_20, %c0_21, %c0_22] : memref<1x1x8xf32, #tpu.memory_space<vmem>>, vector<1x1x8xf32>
    tpu.vector_store %arg8[%c0_20, %c0_21, %c0_22], %37 {strides = array<i32>} : memref<1x1x8xf32, #tpu.memory_space<vmem>>, vector<1x1x8xf32>,
    return
  }
  func.func @transform_0(%arg0: i32) -> (i32, i32) {
    %c0_i32 = arith.constant 0 : i32
    %c0_i32_0 = arith.constant 0 : i32
    return %arg0, %c0_i32 : i32, i32
  }
  func.func @transform_1(%arg0: i32) -> (i32, i32) {
    %c0_i32 = arith.constant 0 : i32
    %c0_i32_0 = arith.constant 0 : i32
    %c0_i32_1 = arith.constant 0 : i32
    return %c0_i32, %c0_i32_0 : i32, i32
  }
  func.func @transform_2(%arg0: i32) -> (i32, i32) {
    %c0_i32 = arith.constant 0 : i32
    %c0_i32_0 = arith.constant 0 : i32
    %c0_i32_1 = arith.constant 0 : i32
    return %c0_i32, %c0_i32_0 : i32, i32
  }
  func.func @transform_3(%arg0: i32) -> (i32, i32) {
    %c0_i32 = arith.constant 0 : i32
    %c0_i32_0 = arith.constant 0 : i32
    %c0_i32_1 = arith.constant 0 : i32
    return %c0_i32, %c0_i32_0 : i32, i32
  }
  func.func @transform_4(%arg0: i32) -> (i32, i32) {
    %c0_i32 = arith.constant 0 : i32
    %c0_i32_0 = arith.constant 0 : i32
    %c0_i32_1 = arith.constant 0 : i32
    return %c0_i32, %c0_i32_0 : i32, i32
  }
  func.func @transform_5(%arg0: i32) -> (i32, i32) {
    %c0_i32 = arith.constant 0 : i32
    %c0_i32_0 = arith.constant 0 : i32
    %c0_i32_1 = arith.constant 0 : i32
    return %c0_i32, %c0_i32_0 : i32, i32
  }
  func.func @transform_6(%arg0: i32) -> (i32, i32) {
    %c0_i32 = arith.constant 0 : i32
    %c0_i32_0 = arith.constant 0 : i32
    %c0_i32_1 = arith.constant 0 : i32
    return %c0_i32, %c0_i32_0 : i32, i32
  }
  func.func @transform_7(%arg0: i32) -> (i32, i32, i32) {
    %c0_i32 = arith.constant 0 : i32
    %c0_i32_0 = arith.constant 0 : i32
    %c0_i32_1 = arith.constant 0 : i32
    return %arg0, %c0_i32, %c0_i32_0 : i32, i32, i32
  }
}

</mosaic_0001>

<bundles_post_ra>
// kernel: tpu_custom_call.1
= control target key start
LH: loop header
LB: loop body
LE: loop exit
PB: predicated region body
PF: predicated region fallthrough
CT: control target
= control target key end

     0   :  { %s3151_s0 = inlined_call_operand.hbm [shape: f32[8,784], index: 0, kind: input, shape index: {}]   ;;  %s3152_s1 = inlined_call_operand.hbm [shape: bf16[784,512], index: 1, kind: input, shape index: {}]   ;;  %s3153_s2 = inlined_call_operand.vmem [shape: f32[1,512], index: 2, kind: input, shape index: {}]   ;;  %s3154_s3 = inlined_call_operand.hbm [shape: bf16[512,256], index: 3, kind: input, shape index: {}]   ;;  %s3155_s4 = inlined_call_operand.vmem [shape: f32[1,256], index: 4, kind: input, shape index: {}]   ;;  %s3156_s5 = inlined_call_operand.vmem [shape: f32[1,256], index: 5, kind: input, shape index: {}]   ;;  %s3157_s6 = inlined_call_operand.<no memory space> [shape: f32[1,1], index: 6, kind: input, shape index: {}]   ;;  %s3158_s7 = inlined_call_operand.hbm [shape: f32[1,1,8], index: 7, kind: output, shape index: {}]  }
   0x1   :  { %v12_v0 = vstv %s3157_s6 }
   0x2   :  { %13 = vst [vmem:[#allocation2] sm:$0x1] %v12_v0 }
   0x3   :  { %14 = vsyncpa [#allocation4], 0 }
   0x4   :  { %15 = vsyncpa [#allocation7], 0 }
   0x5   :  { %16 = vsyncpa [#allocation5], 0  ;;  %s2988_s26 = smov [#allocation6]   ;;  %s2894_s30 = scalar_lea.hbm %s3152_s1, 25088 }
   0x6   :  { %s32_s27 = sshll.u32 %s2988_s26, 4  ;;  %p2895_p0 = scmp.ne.s32.totalorder %s3152_s1, %s2894_s30  ;;  %s33_s27 = int_to_ptr.vmem [resolvable:$true] %s32_s27 }
   0x7   :  { %p2898_p1 = scmp.lt.u32.totalorder %s2894_s30, %s3152_s1 }
   0x9   :  { %p2900_p2 = pnand %p2898_p1, %p2895_p0 }
   0xb   :  { %2903 = shalt.err (!%p2900_p2)
}
   0xc   :  { %s2904_s6 = scalar_lea.vmem %s33_s27, 25088  ;;  %p2909_p4 = scmp.lt.s32.totalorder %s33_s27, %s33_s27 }
   0xd   :  { %p2905_p3 = scmp.ne.s32.totalorder %s33_s27, %s2904_s6  ;;  %p2910_p5 = scmp.lt.s32.totalorder %s2904_s6, %s2904_s6 }
   0xf   :  { %p2911_p6 = por %p2910_p5, %p2909_p4 }
  0x11   :  { %p2912_p7 = pnand %p2911_p6, %p2905_p3 }
  0x13   :  { %2915 = shalt.err (!%p2912_p7)
}
  0x14   :  { %s2989_s12 = smov 256   ;;  %s2990_s13 = smov 16  }
  0x15   :  { %38 = dma.hbm_to_vmem [thread:$0]  %s3152_s1, 25088, %s33_s27, [#allocation7], %s2989_s12, %s2989_s12, %s2990_s13  }
  0x16   :  { %s2991_s16 = smov [#allocation3]   ;;  %s2992_s18 = smov [#allocation8]  }
  0x17   :  { %s23_s17 = sshll.u32 %s2991_s16, 4  ;;  %s46_s19 = sshll.u32 %s2992_s18, 4  ;;  %s24_s17 = int_to_ptr.vmem [resolvable:$true] %s23_s17  ;;  %s47_s19 = int_to_ptr.vmem [resolvable:$true] %s46_s19 }
  0x18   :  { %s2916_s22 = scalar_lea.hbm %s3151_s0, 896 }
  0x19   :  { %p2917_p8 = scmp.ne.s32.totalorder %s3151_s0, %s2916_s22  ;;  %p2920_p9 = scmp.lt.u32.totalorder %s2916_s22, %s3151_s0 }
  0x1b   :  { %p2922_p10 = pnand %p2920_p9, %p2917_p8 }
  0x1d   :  { %2925 = shalt.err (!%p2922_p10)
}
  0x1e   :  { %s2926_s1 = scalar_lea.vmem %s24_s17, 896  ;;  %p2931_p12 = scmp.lt.s32.totalorder %s24_s17, %s24_s17 }
  0x1f   :  { %p2927_p11 = scmp.ne.s32.totalorder %s24_s17, %s2926_s1  ;;  %p2932_p13 = scmp.lt.s32.totalorder %s2926_s1, %s2926_s1 }
  0x21   :  { %p2933_p0 = por %p2932_p13, %p2931_p12 }
  0x23   :  { %p2934_p1 = pnand %p2933_p0, %p2927_p11 }
  0x25   :  { %2937 = shalt.err (!%p2934_p1)
}
  0x26   :  { %26 = dma.hbm_to_vmem [thread:$0]  %s3151_s0, 896, %s24_s17, [#allocation4]  }
  0x27   :  { %s2938_s8 = scalar_lea.hbm %s3154_s3, 8192 }
  0x28   :  { %p2939_p2 = scmp.ne.s32.totalorder %s3154_s3, %s2938_s8  ;;  %p2942_p3 = scmp.lt.u32.totalorder %s2938_s8, %s3154_s3 }
  0x2a   :  { %p2944_p4 = pnand %p2942_p3, %p2939_p2 }
  0x2c   :  { %2947 = shalt.err (!%p2944_p4)
}
  0x2d   :  { %s2948_s12 = scalar_lea.vmem %s47_s19, 8192  ;;  %p2953_p6 = scmp.lt.s32.totalorder %s47_s19, %s47_s19 }
  0x2e   :  { %p2949_p5 = scmp.ne.s32.totalorder %s47_s19, %s2948_s12  ;;  %p2954_p7 = scmp.lt.s32.totalorder %s2948_s12, %s2948_s12 }
  0x30   :  { %p2955_p8 = por %p2954_p7, %p2953_p6 }
  0x32   :  { %p2956_p9 = pnand %p2955_p8, %p2949_p5 }
  0x34   :  { %2959 = shalt.err (!%p2956_p9)
}
  0x35   :  { %s2993_s0 = smov 128   ;;  %s2994_s13 = smov 8  }
  0x36   :  { %52 = dma.hbm_to_vmem [thread:$0]  %s3154_s3, 8192, %s47_s19, [#allocation7], %s2993_s0, %s2993_s0, %s2994_s13  }
  0x37   :  { %2982 = dma.done.wait [#allocation4], 896  }
  0x38   :  { %2983 = vsyncadd [#allocation4], 4294966400 }
  0x39   :  { %2984 = dma.done.wait [#allocation7], 33280  }
  0x3a   :  { %2985 = vsyncadd [#allocation7], 4294934016  ;;  %v2500_v1 = vld [vmem:[#allocation6 + $0x4] ss:$16 sps:$4 sm:$0xff]   ;;  %v2504_v3 = vld [vmem:[#allocation6] ss:$16 sps:$4 sm:$0xff]  }
  0x3b   :  { %v2502_v2 = vld [vmem:[#allocation6 + $0x204] ss:$16 sps:$4 sm:$0xff]   ;;  %1285 = vmatprep.subr.bf16.mxu1 %v2500_v1  ;;  %v2505_v4 = vld [vmem:[#allocation6 + $0x200] ss:$16 sps:$4 sm:$0xff]   ;;  %vm1281_vm0 = vcmask 130048   ;;  %vm2176_vm7 = vcmask 57344  }
  0x3c   :  { %1326 = vmatprep.subr.bf16.mxu0 %v2502_v2  ;;  %v2506_v5 = vld [vmem:[#allocation6 + $0x24] ss:$16 sps:$4 sm:$0xff]   ;;  %1286 = vmatpush1.bf16.msra.mxu1 %v2504_v3  ;;  %v2510_v7 = vld [vmem:[#allocation6 + $0x20] ss:$16 sps:$4 sm:$0xff]  }
  0x3d   :  { %1327 = vmatpush1.bf16.msra.mxu0 %v2505_v4  ;;  %v2508_v6 = vld [vmem:[#allocation6 + $0x224] ss:$16 sps:$4 sm:$0xff]   ;;  %1287 = vmatprep.subr.bf16.mxu1 %v2506_v5  ;;  %v2511_v8 = vld [vmem:[#allocation6 + $0x220] ss:$16 sps:$4 sm:$0xff]   ;;  %v69_v5 = vld [vmem:[#allocation3] sm:$0xff] }
  0x3e   :  { %1328 = vmatprep.subr.bf16.mxu0 %v2508_v6  ;;  %v2512_v9 = vld [vmem:[#allocation6 + $0x44] ss:$16 sps:$4 sm:$0xff]   ;;  %v2516_v11 = vld [vmem:[#allocation6 + $0x40] ss:$16 sps:$4 sm:$0xff]  }
  0x3f   :  { %v2514_v10 = vld [vmem:[#allocation6 + $0x244] ss:$16 sps:$4 sm:$0xff]   ;;  %v2517_v12 = vld [vmem:[#allocation6 + $0x240] ss:$16 sps:$4 sm:$0xff]  }
  0x40   :  { %1288 = vmatpush1.bf16.msra.mxu1 %v2510_v7  ;;  %v2518_v13 = vld [vmem:[#allocation6 + $0x64] ss:$16 sps:$4 sm:$0xff]   ;;  %v2522_v15 = vld [vmem:[#allocation6 + $0x60] ss:$16 sps:$4 sm:$0xff]   ;;  %v71_v7 = vld [vmem:[#allocation3 + $0x10] sm:$0xff] }
  0x41   :  { %1329 = vmatpush1.bf16.msra.mxu0 %v2511_v8  ;;  %1289 = vmatprep.subr.bf16.mxu1 %v2512_v9  ;;  %v2520_v14 = vld [vmem:[#allocation6 + $0x264] ss:$16 sps:$4 sm:$0xff]   ;;  %v2523_v16 = vld [vmem:[#allocation6 + $0x260] ss:$16 sps:$4 sm:$0xff]   ;;  %v2601_v8 = vld [vmem:[#allocation6 + $0xc] ss:$16 sps:$4 sm:$0xff]   ;;  %v3082_v9 = vpack.c.bf16 %v69_v5, %v69_v5 }
  0x42   :  { %1330 = vmatprep.subr.bf16.mxu0 %v2514_v10  ;;  %v2524_v17 = vld [vmem:[#allocation6 + $0x84] ss:$16 sps:$4 sm:$0xff]   ;;  %v2528_v19 = vld [vmem:[#allocation6 + $0x80] ss:$16 sps:$4 sm:$0xff]   ;;  %v2685_v5 = vld [vmem:[#allocation6 + $0x1cc] ss:$16 sps:$4 sm:$0xff]  }
  0x43   :  { %v2526_v18 = vld [vmem:[#allocation6 + $0x284] ss:$16 sps:$4 sm:$0xff]   ;;  %v2529_v20 = vld [vmem:[#allocation6 + $0x280] ss:$16 sps:$4 sm:$0xff]  }
  0x44   :  { %1290 = vmatpush1.bf16.msra.mxu1 %v2516_v11  ;;  %v2530_v21 = vld [vmem:[#allocation6 + $0xa4] ss:$16 sps:$4 sm:$0xff]   ;;  %v2534_v23 = vld [vmem:[#allocation6 + $0xa0] ss:$16 sps:$4 sm:$0xff]   ;;  %v2599_v11 = vld [vmem:[#allocation6 + $0x8] ss:$16 sps:$4 sm:$0xff]  }
  0x45   :  { %1331 = vmatpush1.bf16.msra.mxu0 %v2517_v12  ;;  %1291 = vmatprep.subr.bf16.mxu1 %v2518_v13  ;;  %v2532_v22 = vld [vmem:[#allocation6 + $0x2a4] ss:$16 sps:$4 sm:$0xff]   ;;  %v2535_v24 = vld [vmem:[#allocation6 + $0x2a0] ss:$16 sps:$4 sm:$0xff]   ;;  %v3084_v12 = vpack.c.bf16 %v71_v7, %v71_v7  ;;  %v2683_v7 = vld [vmem:[#allocation6 + $0x1c8] ss:$16 sps:$4 sm:$0xff]  }
  0x46   :  { %1332 = vmatprep.subr.bf16.mxu0 %v2520_v14  ;;  %v2536_v25 = vld [vmem:[#allocation6 + $0xc4] ss:$16 sps:$4 sm:$0xff]   ;;  %v2540_v27 = vld [vmem:[#allocation6 + $0xc0] ss:$16 sps:$4 sm:$0xff]   ;;  %v2607_v14 = vld [vmem:[#allocation6 + $0x2c] ss:$16 sps:$4 sm:$0xff]  }
  0x47   :  { %v2538_v26 = vld [vmem:[#allocation6 + $0x2c4] ss:$16 sps:$4 sm:$0xff]   ;;  %v2541_v28 = vld [vmem:[#allocation6 + $0x2c0] ss:$16 sps:$4 sm:$0xff]  }
  0x48   :  { %1292 = vmatpush1.bf16.msra.mxu1 %v2522_v15  ;;  %v2542_v29 = vld [vmem:[#allocation6 + $0xe4] ss:$16 sps:$4 sm:$0xff]   ;;  %v2546_v31 = vld [vmem:[#allocation6 + $0xe0] ss:$16 sps:$4 sm:$0xff]  }
  0x49   :  { %1333 = vmatpush1.bf16.msra.mxu0 %v2523_v16  ;;  %1293 = vmatprep.subr.bf16.mxu1 %v2524_v17  ;;  %v2544_v30 = vld [vmem:[#allocation6 + $0x2e4] ss:$16 sps:$4 sm:$0xff]   ;;  %v2547_v32 = vld [vmem:[#allocation6 + $0x2e0] ss:$16 sps:$4 sm:$0xff]   ;;  %v2605_v16 = vld [vmem:[#allocation6 + $0x28] ss:$16 sps:$4 sm:$0xff]  }
  0x4a   :  { %1334 = vmatprep.subr.bf16.mxu0 %v2526_v18  ;;  %v2548_v33 = vld [vmem:[#allocation6 + $0x104] ss:$16 sps:$4 sm:$0xff]   ;;  %v2552_v35 = vld [vmem:[#allocation6 + $0x100] ss:$16 sps:$4 sm:$0xff]   ;;  %v2613_v18 = vld [vmem:[#allocation6 + $0x4c] ss:$16 sps:$4 sm:$0xff]  }
  0x4b   :  { %v2550_v34 = vld [vmem:[#allocation6 + $0x304] ss:$16 sps:$4 sm:$0xff]   ;;  %v2553_v36 = vld [vmem:[#allocation6 + $0x300] ss:$16 sps:$4 sm:$0xff]  }
  0x4c   :  { %1294 = vmatpush1.bf16.msra.mxu1 %v2528_v19  ;;  %v2554_v37 = vld [vmem:[#allocation6 + $0x124] ss:$16 sps:$4 sm:$0xff]   ;;  %v2558_v39 = vld [vmem:[#allocation6 + $0x120] ss:$16 sps:$4 sm:$0xff]  }
  0x4d   :  { %1335 = vmatpush1.bf16.msra.mxu0 %v2529_v20  ;;  %1295 = vmatprep.subr.bf16.mxu1 %v2530_v21  ;;  %v2556_v38 = vld [vmem:[#allocation6 + $0x324] ss:$16 sps:$4 sm:$0xff]   ;;  %v2559_v40 = vld [vmem:[#allocation6 + $0x320] ss:$16 sps:$4 sm:$0xff]   ;;  %v2611_v20 = vld [vmem:[#allocation6 + $0x48] ss:$16 sps:$4 sm:$0xff]  }
  0x4e   :  { %1336 = vmatprep.subr.bf16.mxu0 %v2532_v22  ;;  %v2560_v41 = vld [vmem:[#allocation6 + $0x144] ss:$16 sps:$4 sm:$0xff]   ;;  %v2564_v43 = vld [vmem:[#allocation6 + $0x140] ss:$16 sps:$4 sm:$0xff]   ;;  %v2619_v22 = vld [vmem:[#allocation6 + $0x6c] ss:$16 sps:$4 sm:$0xff]  }
  0x4f   :  { %v2562_v42 = vld [vmem:[#allocation6 + $0x344] ss:$16 sps:$4 sm:$0xff]   ;;  %v2565_v44 = vld [vmem:[#allocation6 + $0x340] ss:$16 sps:$4 sm:$0xff]  }
  0x50   :  { %1296 = vmatpush1.bf16.msra.mxu1 %v2534_v23  ;;  %v2566_v45 = vld [vmem:[#allocation6 + $0x164] ss:$16 sps:$4 sm:$0xff]   ;;  %v2570_v48 = vld [vmem:[#allocation6 + $0x160] ss:$16 sps:$4 sm:$0xff]  }
  0x51   :  { %1337 = vmatpush1.bf16.msra.mxu0 %v2535_v24  ;;  %1297 = vmatprep.subr.bf16.mxu1 %v2536_v25  ;;  %v2568_v46 = vld [vmem:[#allocation6 + $0x364] ss:$16 sps:$4 sm:$0xff]   ;;  %v2571_v51 = vld [vmem:[#allocation6 + $0x360] ss:$16 sps:$4 sm:$0xff]   ;;  %v2617_v24 = vld [vmem:[#allocation6 + $0x68] ss:$16 sps:$4 sm:$0xff]  }
  0x52   :  { %1338 = vmatprep.subr.bf16.mxu0 %v2538_v26  ;;  %v70_v47 = vld [vmem:[#allocation3 + $0x8] sm:$0xff]  ;;  %v72_v50 = vld [vmem:[#allocation3 + $0x18] sm:$0xff]  ;;  %v2625_v26 = vld [vmem:[#allocation6 + $0x8c] ss:$16 sps:$4 sm:$0xff]  }
  0x53   :  { %v3076_v49 = vpack.c.bf16 %v70_v47, %v70_v47  ;;  %v2572_v52 = vld [vmem:[#allocation6 + $0x184] ss:$16 sps:$4 sm:$0xff]   ;;  %v3078_v53 = vpack.c.bf16 %v72_v50, %v72_v50  ;;  %v2576_v55 = vld [vmem:[#allocation6 + $0x180] ss:$16 sps:$4 sm:$0xff]   ;;  %v2653_v50 = vld [vmem:[#allocation6 + $0x128] ss:$16 sps:$4 sm:$0xff]  }
  0x54   :  { %1298 = vmatpush1.bf16.msra.mxu1 %v2540_v27  ;;  %v2574_v54 = vld [vmem:[#allocation6 + $0x384] ss:$16 sps:$4 sm:$0xff]   ;;  %v2577_v56 = vld [vmem:[#allocation6 + $0x380] ss:$16 sps:$4 sm:$0xff]  }
  0x55   :  { %1339 = vmatpush1.bf16.msra.mxu0 %v2541_v28  ;;  %1299 = vmatprep.subr.bf16.mxu1 %v2542_v29  ;;  %v2578_v57 = vld [vmem:[#allocation6 + $0x1a4] ss:$16 sps:$4 sm:$0xff]   ;;  %v2582_v59 = vld [vmem:[#allocation6 + $0x1a0] ss:$16 sps:$4 sm:$0xff]   ;;  %v2623_v28 = vld [vmem:[#allocation6 + $0x88] ss:$16 sps:$4 sm:$0xff]  }
  0x56   :  { %1340 = vmatprep.subr.bf16.mxu0 %v2544_v30  ;;  %1317 = vmatprep.mubr.bf16.mxu1 %v3076_v49  ;;  %v2580_v58 = vld [vmem:[#allocation6 + $0x3a4] ss:$16 sps:$4 sm:$0xff]   ;;  %v2583_v60 = vld [vmem:[#allocation6 + $0x3a0] ss:$16 sps:$4 sm:$0xff]   ;;  %v2631_v30 = vld [vmem:[#allocation6 + $0xac] ss:$16 sps:$4 sm:$0xff]  }
  0x57   :  { %1358 = vmatprep.mubr.bf16.mxu0 %v3078_v53  ;;  %v2584_v61 = vld [vmem:[#allocation6 + $0x1c4] ss:$16 sps:$4 sm:$0xff]   ;;  %v2588_v63 = vld [vmem:[#allocation6 + $0x1c0] ss:$16 sps:$4 sm:$0xff]  }
  0x58   :  { %1300 = vmatpush1.bf16.msra.mxu1 %v2546_v31  ;;  %v2586_v62 = vld [vmem:[#allocation6 + $0x3c4] ss:$16 sps:$4 sm:$0xff]   ;;  %v2589_v0 = vld [vmem:[#allocation6 + $0x3c0] ss:$16 sps:$4 sm:$0xff]  }
  0x59   :  { %1341 = vmatpush1.bf16.msra.mxu0 %v2547_v32  ;;  %1301 = vmatprep.subr.bf16.mxu1 %v2548_v33  ;;  %v2590_v1 = vld [vmem:[#allocation6 + $0x1e4] ss:$16 sps:$4 sm:$0xff]   ;;  %v2594_v3 = vld [vmem:[#allocation6 + $0x1e0] ss:$16 sps:$4 sm:$0xff]   ;;  %v2629_v32 = vld [vmem:[#allocation6 + $0xa8] ss:$16 sps:$4 sm:$0xff]  }
  0x5a   :  { %1342 = vmatprep.subr.bf16.mxu0 %v2550_v34  ;;  %v2592_v2 = vld [vmem:[#allocation6 + $0x3e4] ss:$16 sps:$4 sm:$0xff]   ;;  %v2595_v4 = vld [vmem:[#allocation6 + $0x3e0] ss:$16 sps:$4 sm:$0xff]   ;;  %v2637_v34 = vld [vmem:[#allocation6 + $0xcc] ss:$16 sps:$4 sm:$0xff]  }
  0x5b   :  { %v2598_v6 = vld [vmem:[#allocation6 + $0x404] ss:$16 sps:$4 sm:$0xff]   ;;  %v2596_v10 = vld [vmem:[#allocation6 + $0x400] ss:$16 sps:$4 sm:$0xff]  }
  0x5c   :  { %1302 = vmatpush1.bf16.msra.mxu1 %v2552_v35  ;;  %v2604_v13 = vld [vmem:[#allocation6 + $0x424] ss:$16 sps:$4 sm:$0xff]   ;;  %v2602_v15 = vld [vmem:[#allocation6 + $0x420] ss:$16 sps:$4 sm:$0xff]  }
  0x5d   :  { %1343 = vmatpush1.bf16.msra.mxu0 %v2553_v36  ;;  %1303 = vmatprep.subr.bf16.mxu1 %v2554_v37  ;;  %v2610_v17 = vld [vmem:[#allocation6 + $0x444] ss:$16 sps:$4 sm:$0xff]   ;;  %v2608_v19 = vld [vmem:[#allocation6 + $0x440] ss:$16 sps:$4 sm:$0xff]  }
  0x5e   :  { %1344 = vmatprep.subr.bf16.mxu0 %v2556_v38  ;;  %v2616_v21 = vld [vmem:[#allocation6 + $0x464] ss:$16 sps:$4 sm:$0xff]   ;;  %v2614_v23 = vld [vmem:[#allocation6 + $0x460] ss:$16 sps:$4 sm:$0xff]   ;;  %v2635_v38 = vld [vmem:[#allocation6 + $0xc8] ss:$16 sps:$4 sm:$0xff]  }
  0x5f   :  { %v2622_v25 = vld [vmem:[#allocation6 + $0x484] ss:$16 sps:$4 sm:$0xff]   ;;  %v2620_v27 = vld [vmem:[#allocation6 + $0x480] ss:$16 sps:$4 sm:$0xff]  }
  0x60   :  { %1304 = vmatpush1.bf16.msra.mxu1 %v2558_v39  ;;  %v2628_v29 = vld [vmem:[#allocation6 + $0x4a4] ss:$16 sps:$4 sm:$0xff]   ;;  %v2626_v31 = vld [vmem:[#allocation6 + $0x4a0] ss:$16 sps:$4 sm:$0xff]  }
  0x61   :  { %1345 = vmatpush1.bf16.msra.mxu0 %v2559_v40  ;;  %1305 = vmatprep.subr.bf16.mxu1 %v2560_v41  ;;  %v2634_v33 = vld [vmem:[#allocation6 + $0x4c4] ss:$16 sps:$4 sm:$0xff]   ;;  %v2632_v37 = vld [vmem:[#allocation6 + $0x4c0] ss:$16 sps:$4 sm:$0xff]   ;;  %v2643_v40 = vld [vmem:[#allocation6 + $0xec] ss:$16 sps:$4 sm:$0xff]  }
  0x62   :  { %1346 = vmatprep.subr.bf16.mxu0 %v2562_v42  ;;  %v74_v35 = vld [vmem:[#allocation3 + $0x28] sm:$0xff]  ;;  %v2641_v42 = vld [vmem:[#allocation6 + $0xe8] ss:$16 sps:$4 sm:$0xff]  }
  0x63   :  { %v3089_v36 = vpack.c.bf16 %v74_v35, %v74_v35  ;;  %v2640_v39 = vld [vmem:[#allocation6 + $0x4e4] ss:$16 sps:$4 sm:$0xff]   ;;  %v2638_v41 = vld [vmem:[#allocation6 + $0x4e0] ss:$16 sps:$4 sm:$0xff]  }
  0x64   :  { %1306 = vmatpush1.bf16.msra.mxu1 %v2564_v43  ;;  %v2646_v43 = vld [vmem:[#allocation6 + $0x504] ss:$16 sps:$4 sm:$0xff]  }
  0x65   :  { %1347 = vmatpush1.bf16.msra.mxu0 %v2565_v44  ;;  %1307 = vmatprep.subr.bf16.mxu1 %v2566_v45  ;;  %v2649_v44 = vld [vmem:[#allocation6 + $0x10c] ss:$16 sps:$4 sm:$0xff]   ;;  %v2644_v45 = vld [vmem:[#allocation6 + $0x500] ss:$16 sps:$4 sm:$0xff]   ;;  %v2652_v47 = vld [vmem:[#allocation6 + $0x524] ss:$16 sps:$4 sm:$0xff]  }
  0x66   :  { %1348 = vmatprep.subr.bf16.mxu0 %v2568_v46  ;;  %v2647_v46 = vld [vmem:[#allocation6 + $0x108] ss:$16 sps:$4 sm:$0xff]   ;;  %v2796_v35 = vld [vmem:[#allocation8 + $0x4] ss:$8 sps:$4 sm:$0xff]  }
  0x68   :  { %1308 = vmatpush1.bf16.msra.mxu1 %v2570_v48  ;;  %v2655_v48 = vld [vmem:[#allocation6 + $0x12c] ss:$16 sps:$4 sm:$0xff]  }
  0x69   :  { %1349 = vmatpush1.bf16.msra.mxu0 %v2571_v51  ;;  %1309 = vmatprep.subr.bf16.mxu1 %v2572_v52  ;;  %v2658_v51 = vld [vmem:[#allocation6 + $0x544] ss:$16 sps:$4 sm:$0xff]   ;;  %v2661_v52 = vld [vmem:[#allocation6 + $0x14c] ss:$16 sps:$4 sm:$0xff]  }
  0x6a   :  { %1350 = vmatprep.subr.bf16.mxu0 %v2574_v54  ;;  %v2656_v54 = vld [vmem:[#allocation6 + $0x540] ss:$16 sps:$4 sm:$0xff]  }
  0x6c   :  { %1310 = vmatpush1.bf16.msra.mxu1 %v2576_v55  ;;  %v2659_v55 = vld [vmem:[#allocation6 + $0x148] ss:$16 sps:$4 sm:$0xff]  }
  0x6d   :  { %1351 = vmatpush1.bf16.msra.mxu0 %v2577_v56  ;;  %1311 = vmatprep.subr.bf16.mxu1 %v2578_v57  ;;  %v2664_v56 = vld [vmem:[#allocation6 + $0x564] ss:$16 sps:$4 sm:$0xff]   ;;  %v2667_v57 = vld [vmem:[#allocation6 + $0x16c] ss:$16 sps:$4 sm:$0xff]  }
  0x6e   :  { %1352 = vmatprep.subr.bf16.mxu0 %v2580_v58  ;;  %v2662_v58 = vld [vmem:[#allocation6 + $0x560] ss:$16 sps:$4 sm:$0xff]  }
  0x70   :  { %1312 = vmatpush1.bf16.msra.mxu1 %v2582_v59  ;;  %v2665_v59 = vld [vmem:[#allocation6 + $0x168] ss:$16 sps:$4 sm:$0xff]  }
  0x71   :  { %1353 = vmatpush1.bf16.msra.mxu0 %v2583_v60  ;;  %1313 = vmatprep.subr.bf16.mxu1 %v2584_v61  ;;  %v2670_v60 = vld [vmem:[#allocation6 + $0x584] ss:$16 sps:$4 sm:$0xff]   ;;  %v2673_v61 = vld [vmem:[#allocation6 + $0x18c] ss:$16 sps:$4 sm:$0xff]  }
  0x72   :  { %1354 = vmatprep.subr.bf16.mxu0 %v2586_v62  ;;  %v2668_v62 = vld [vmem:[#allocation6 + $0x580] ss:$16 sps:$4 sm:$0xff]  }
  0x74   :  { %1314 = vmatpush1.bf16.msra.mxu1 %v2588_v63  ;;  %v2671_v63 = vld [vmem:[#allocation6 + $0x188] ss:$16 sps:$4 sm:$0xff]  }
  0x75   :  { %1355 = vmatpush1.bf16.msra.mxu0 %v2589_v0  ;;  %1315 = vmatprep.subr.bf16.mxu1 %v2590_v1  ;;  %v2676_v0 = vld [vmem:[#allocation6 + $0x5a4] ss:$16 sps:$4 sm:$0xff]   ;;  %v2679_v1 = vld [vmem:[#allocation6 + $0x1ac] ss:$16 sps:$4 sm:$0xff]  }
  0x76   :  { %1356 = vmatprep.subr.bf16.mxu0 %v2592_v2  ;;  %v2674_v2 = vld [vmem:[#allocation6 + $0x5a0] ss:$16 sps:$4 sm:$0xff]  }
  0x78   :  { %1316 = vmatpush1.bf16.msra.mxu1 %v2594_v3  ;;  %v2677_v3 = vld [vmem:[#allocation6 + $0x1a8] ss:$16 sps:$4 sm:$0xff]  }
  0x79   :  { %1357 = vmatpush1.bf16.msra.mxu0 %v2595_v4  ;;  %1449 = vmatprep.subr.bf16.mxu1 %v2601_v8  ;;  %v2682_v4 = vld [vmem:[#allocation6 + $0x5c4] ss:$16 sps:$4 sm:$0xff]  }
  0x7a   :  { %1367 = vmatprep.subr.bf16.mxu0 %v2598_v6  ;;  %v2680_v6 = vld [vmem:[#allocation6 + $0x5c0] ss:$16 sps:$4 sm:$0xff]   ;;  %v2688_v8 = vld [vmem:[#allocation6 + $0x5e4] ss:$16 sps:$4 sm:$0xff]  }
  0x7b   :  { %1318 = vmatmul.mubr.bf16.vlgmr.msra.gmra.mrb[0].mxu1 %v3082_v9 }
  0x7c   :  { %1359 = vmatmul.mubr.bf16.vlgmr.msra.gmra.mrb[0].mxu0 %v3084_v12  ;;  %1450 = vmatpush1.bf16.msra.mxu1 %v2599_v11  ;;  %v2686_v11 = vld [vmem:[#allocation6 + $0x5e0] ss:$16 sps:$4 sm:$0xff]  }
  0x7d   :  { %1368 = vmatpush1.bf16.msra.mxu0 %v2596_v10  ;;  %1451 = vmatprep.subr.bf16.mxu1 %v2607_v14  ;;  %v2691_v10 = vld [vmem:[#allocation6 + $0x1ec] ss:$16 sps:$4 sm:$0xff]  }
  0x7e   :  { %1369 = vmatprep.subr.bf16.mxu0 %v2604_v13  ;;  %1481 = vmatprep.mubr.bf16.mxu1 %v3076_v49  ;;  %v2650_v49 = vld [vmem:[#allocation6 + $0x520] ss:$16 sps:$4 sm:$0xff]   ;;  %v2689_v13 = vld [vmem:[#allocation6 + $0x1e8] ss:$16 sps:$4 sm:$0xff]  }
  0x7f   :  { %1399 = vmatprep.mubr.bf16.mxu0 %v3089_v36  ;;  %v73_v14 = vld [vmem:[#allocation3 + $0x20] sm:$0xff] }
  0x80   :  { %1452 = vmatpush1.bf16.msra.mxu1 %v2605_v16  ;;  %v2700_v16 = vld [vmem:[#allocation6 + $0x604] ss:$16 sps:$4 sm:$0xff]  }
  0x81   :  { %1370 = vmatpush1.bf16.msra.mxu0 %v2602_v15  ;;  %1453 = vmatprep.subr.bf16.mxu1 %v2613_v18  ;;  %v2694_v15 = vld [vmem:[#allocation6 + $0x20c] ss:$16 sps:$4 sm:$0xff]   ;;  %v2692_v18 = vld [vmem:[#allocation6 + $0x208] ss:$16 sps:$4 sm:$0xff]  }
  0x82   :  { %1371 = vmatprep.subr.bf16.mxu0 %v2610_v17  ;;  %v3092_v17 = vpack.c.bf16 %v73_v14, %v73_v14  ;;  %v2748_v14 = vld [vmem:[#allocation6 + $0x42c] ss:$16 sps:$4 sm:$0xff]  }
  0x84   :  { %1454 = vmatpush1.bf16.msra.mxu1 %v2611_v20  ;;  %v2697_v20 = vld [vmem:[#allocation6 + $0x22c] ss:$16 sps:$4 sm:$0xff]  }
  0x85   :  { %1372 = vmatpush1.bf16.msra.mxu0 %v2608_v19  ;;  %1455 = vmatprep.subr.bf16.mxu1 %v2619_v22  ;;  %v2698_v19 = vld [vmem:[#allocation6 + $0x600] ss:$16 sps:$4 sm:$0xff]   ;;  %v2703_v22 = vld [vmem:[#allocation6 + $0x24c] ss:$16 sps:$4 sm:$0xff]  }
  0x86   :  { %1373 = vmatprep.subr.bf16.mxu0 %v2616_v21  ;;  %v2695_v21 = vld [vmem:[#allocation6 + $0x228] ss:$16 sps:$4 sm:$0xff]  }
  0x88   :  { %1456 = vmatpush1.bf16.msra.mxu1 %v2617_v24  ;;  %v2701_v24 = vld [vmem:[#allocation6 + $0x248] ss:$16 sps:$4 sm:$0xff]  }
  0x89   :  { %1374 = vmatpush1.bf16.msra.mxu0 %v2614_v23  ;;  %1457 = vmatprep.subr.bf16.mxu1 %v2625_v26  ;;  %v2995_v23 = vmov 0   ;;  %v2706_v26 = vld [vmem:[#allocation6 + $0x26c] ss:$16 sps:$4 sm:$0xff]  }
  0x8a   :  { %1375 = vmatprep.subr.bf16.mxu0 %v2622_v25  ;;  %v75_v25 = vld [vmem:[#allocation3 + $0x30] sm:$0xff] }
  0x8c   :  { %1458 = vmatpush1.bf16.msra.mxu1 %v2623_v28  ;;  %v3098_v28 = vpack.c.bf16 %v75_v25, %v75_v25  ;;  %v2830_v25 = vld [vmem:[#allocation8 + $0xc0] ss:$8 sps:$4 sm:$0xff]  }
  0x8d   :  { %1376 = vmatpush1.bf16.msra.mxu0 %v2620_v27  ;;  %1459 = vmatprep.subr.bf16.mxu1 %v2631_v30  ;;  %v2704_v27 = vld [vmem:[#allocation6 + $0x268] ss:$16 sps:$4 sm:$0xff]   ;;  %v2712_v30 = vld [vmem:[#allocation6 + $0x2ac] ss:$16 sps:$4 sm:$0xff]  }
  0x8e   :  { %1377 = vmatprep.subr.bf16.mxu0 %v2628_v29  ;;  %v2709_v29 = vld [vmem:[#allocation6 + $0x28c] ss:$16 sps:$4 sm:$0xff]  }
  0x90   :  { %1460 = vmatpush1.bf16.msra.mxu1 %v2629_v32  ;;  %v2715_v32 = vld [vmem:[#allocation6 + $0x2cc] ss:$16 sps:$4 sm:$0xff]  }
  0x91   :  { %1378 = vmatpush1.bf16.msra.mxu0 %v2626_v31  ;;  %1461 = vmatprep.subr.bf16.mxu1 %v2637_v34  ;;  %v2710_v31 = vld [vmem:[#allocation6 + $0x2a8] ss:$16 sps:$4 sm:$0xff]  }
  0x92   :  { %1379 = vmatprep.subr.bf16.mxu0 %v2634_v33  ;;  %v2718_v33 = vld [vmem:[#allocation6 + $0x2ec] ss:$16 sps:$4 sm:$0xff]   ;;  %v2794_v34 = vld [vmem:[#allocation8] ss:$8 sps:$4 sm:$0xff]  }
  0x94   :  { %1462 = vmatpush1.bf16.msra.mxu1 %v2635_v38  ;;  %v2716_v38 = vld [vmem:[#allocation6 + $0x2e8] ss:$16 sps:$4 sm:$0xff]  }
  0x95   :  { %1380 = vmatpush1.bf16.msra.mxu0 %v2632_v37  ;;  %1463 = vmatprep.subr.bf16.mxu1 %v2643_v40  ;;  %v2799_v37 = vld [vmem:[#allocation8 + $0x14] ss:$8 sps:$4 sm:$0xff]  }
  0x96   :  { %1381 = vmatprep.subr.bf16.mxu0 %v2640_v39  ;;  %v2797_v39 = vld [vmem:[#allocation8 + $0x10] ss:$8 sps:$4 sm:$0xff]   ;;  %v2721_v40 = vld [vmem:[#allocation6 + $0x30c] ss:$16 sps:$4 sm:$0xff]  }
  0x98   :  { %1464 = vmatpush1.bf16.msra.mxu1 %v2641_v42  ;;  %v2719_v42 = vld [vmem:[#allocation6 + $0x308] ss:$16 sps:$4 sm:$0xff]  }
  0x99   :  { %1382 = vmatpush1.bf16.msra.mxu0 %v2638_v41  ;;  %1465 = vmatprep.subr.bf16.mxu1 %v2649_v44  ;;  %v2802_v41 = vld [vmem:[#allocation8 + $0x24] ss:$8 sps:$4 sm:$0xff]  }
  0x9a   :  { %1383 = vmatprep.subr.bf16.mxu0 %v2646_v43  ;;  %v2800_v43 = vld [vmem:[#allocation8 + $0x20] ss:$8 sps:$4 sm:$0xff]   ;;  %v2724_v44 = vld [vmem:[#allocation6 + $0x32c] ss:$16 sps:$4 sm:$0xff]  }
  0x9c   :  { %1466 = vmatpush1.bf16.msra.mxu1 %v2647_v46  ;;  %v2722_v46 = vld [vmem:[#allocation6 + $0x328] ss:$16 sps:$4 sm:$0xff]  }
  0x9d   :  { %1384 = vmatpush1.bf16.msra.mxu0 %v2644_v45  ;;  %1467 = vmatprep.subr.bf16.mxu1 %v2655_v48  ;;  %v2805_v45 = vld [vmem:[#allocation8 + $0x34] ss:$8 sps:$4 sm:$0xff]  }
  0x9e   :  { %1385 = vmatprep.subr.bf16.mxu0 %v2652_v47  ;;  %v2803_v47 = vld [vmem:[#allocation8 + $0x30] ss:$8 sps:$4 sm:$0xff]   ;;  %v2727_v48 = vld [vmem:[#allocation6 + $0x34c] ss:$16 sps:$4 sm:$0xff]  }
  0xa0   :  { %1468 = vmatpush1.bf16.msra.mxu1 %v2653_v50  ;;  %v2725_v50 = vld [vmem:[#allocation6 + $0x348] ss:$16 sps:$4 sm:$0xff]  }
  0xa1   :  { %1386 = vmatpush1.bf16.msra.mxu0 %v2650_v49  ;;  %1469 = vmatprep.subr.bf16.mxu1 %v2661_v52  ;;  %v2808_v49 = vld [vmem:[#allocation8 + $0x44] ss:$8 sps:$4 sm:$0xff]  }
  0xa2   :  { %1387 = vmatprep.subr.bf16.mxu0 %v2658_v51  ;;  %v2806_v51 = vld [vmem:[#allocation8 + $0x40] ss:$8 sps:$4 sm:$0xff]   ;;  %v2730_v52 = vld [vmem:[#allocation6 + $0x36c] ss:$16 sps:$4 sm:$0xff]  }
  0xa4   :  { %1470 = vmatpush1.bf16.msra.mxu1 %v2659_v55  ;;  %v2728_v55 = vld [vmem:[#allocation6 + $0x368] ss:$16 sps:$4 sm:$0xff]  }
  0xa5   :  { %1388 = vmatpush1.bf16.msra.mxu0 %v2656_v54  ;;  %1471 = vmatprep.subr.bf16.mxu1 %v2667_v57  ;;  %v2811_v54 = vld [vmem:[#allocation8 + $0x54] ss:$8 sps:$4 sm:$0xff]  }
  0xa6   :  { %1389 = vmatprep.subr.bf16.mxu0 %v2664_v56  ;;  %v2809_v56 = vld [vmem:[#allocation8 + $0x50] ss:$8 sps:$4 sm:$0xff]   ;;  %v2733_v57 = vld [vmem:[#allocation6 + $0x38c] ss:$16 sps:$4 sm:$0xff]  }
  0xa8   :  { %1472 = vmatpush1.bf16.msra.mxu1 %v2665_v59  ;;  %v2731_v59 = vld [vmem:[#allocation6 + $0x388] ss:$16 sps:$4 sm:$0xff]  }
  0xa9   :  { %1390 = vmatpush1.bf16.msra.mxu0 %v2662_v58  ;;  %1473 = vmatprep.subr.bf16.mxu1 %v2673_v61  ;;  %v2814_v58 = vld [vmem:[#allocation8 + $0x64] ss:$8 sps:$4 sm:$0xff]  }
  0xaa   :  { %1391 = vmatprep.subr.bf16.mxu0 %v2670_v60  ;;  %v2812_v60 = vld [vmem:[#allocation8 + $0x60] ss:$8 sps:$4 sm:$0xff]   ;;  %v2736_v61 = vld [vmem:[#allocation6 + $0x3ac] ss:$16 sps:$4 sm:$0xff]  }
  0xac   :  { %1474 = vmatpush1.bf16.msra.mxu1 %v2671_v63  ;;  %v2734_v63 = vld [vmem:[#allocation6 + $0x3a8] ss:$16 sps:$4 sm:$0xff]  }
  0xad   :  { %1392 = vmatpush1.bf16.msra.mxu0 %v2668_v62  ;;  %1475 = vmatprep.subr.bf16.mxu1 %v2679_v1  ;;  %v2817_v62 = vld [vmem:[#allocation8 + $0x74] ss:$8 sps:$4 sm:$0xff]  }
  0xae   :  { %1393 = vmatprep.subr.bf16.mxu0 %v2676_v0  ;;  %v2815_v0 = vld [vmem:[#allocation8 + $0x70] ss:$8 sps:$4 sm:$0xff]   ;;  %v2739_v1 = vld [vmem:[#allocation6 + $0x3cc] ss:$16 sps:$4 sm:$0xff]  }
  0xb0   :  { %1476 = vmatpush1.bf16.msra.mxu1 %v2677_v3  ;;  %v2737_v3 = vld [vmem:[#allocation6 + $0x3c8] ss:$16 sps:$4 sm:$0xff]  }
  0xb1   :  { %1394 = vmatpush1.bf16.msra.mxu0 %v2674_v2  ;;  %1477 = vmatprep.subr.bf16.mxu1 %v2685_v5  ;;  %v2820_v2 = vld [vmem:[#allocation8 + $0x84] ss:$8 sps:$4 sm:$0xff]  }
  0xb2   :  { %1395 = vmatprep.subr.bf16.mxu0 %v2682_v4  ;;  %v2818_v4 = vld [vmem:[#allocation8 + $0x80] ss:$8 sps:$4 sm:$0xff]   ;;  %v2742_v5 = vld [vmem:[#allocation6 + $0x3ec] ss:$16 sps:$4 sm:$0xff]  }
  0xb4   :  { %1478 = vmatpush1.bf16.msra.mxu1 %v2683_v7  ;;  %v2740_v7 = vld [vmem:[#allocation6 + $0x3e8] ss:$16 sps:$4 sm:$0xff]  }
  0xb5   :  { %1396 = vmatpush1.bf16.msra.mxu0 %v2680_v6  ;;  %1479 = vmatprep.subr.bf16.mxu1 %v2691_v10  ;;  %v2823_v6 = vld [vmem:[#allocation8 + $0x94] ss:$8 sps:$4 sm:$0xff]  }
  0xb6   :  { %1397 = vmatprep.subr.bf16.mxu0 %v2688_v8  ;;  %v2821_v8 = vld [vmem:[#allocation8 + $0x90] ss:$8 sps:$4 sm:$0xff]   ;;  %v2745_v10 = vld [vmem:[#allocation6 + $0x40c] ss:$16 sps:$4 sm:$0xff]  }
  0xb8   :  { %1480 = vmatpush1.bf16.msra.mxu1 %v2689_v13  ;;  %v2743_v13 = vld [vmem:[#allocation6 + $0x408] ss:$16 sps:$4 sm:$0xff]  }
  0xb9   :  { %1398 = vmatpush1.bf16.msra.mxu0 %v2686_v11  ;;  %1490 = vmatprep.subr.bf16.mxu1 %v2694_v15  ;;  %v2826_v11 = vld [vmem:[#allocation8 + $0xa4] ss:$8 sps:$4 sm:$0xff]   ;;  %v2824_v15 = vld [vmem:[#allocation8 + $0xa0] ss:$8 sps:$4 sm:$0xff]  }
  0xba   :  { %1408 = vmatprep.subr.bf16.mxu0 %v2700_v16  ;;  %v2829_v16 = vld [vmem:[#allocation8 + $0xb4] ss:$8 sps:$4 sm:$0xff]  }
  0xbb   :  { %1482 = vmatmul.mubr.bf16.vlgmr.msra.gmra.mrb[4].mxu1 %v3082_v9  ;;  %v2707_v9 = vld [vmem:[#allocation6 + $0x288] ss:$16 sps:$4 sm:$0xff]  }
  0xbc   :  { %1400 = vmatmul.mubr.bf16.vlgmr.msra.gmra.mrb[0].mxu0 %v3092_v17  ;;  %1491 = vmatpush1.bf16.msra.mxu1 %v2692_v18  ;;  %v2746_v18 = vld [vmem:[#allocation6 + $0x428] ss:$16 sps:$4 sm:$0xff]  }
  0xbd   :  { %1409 = vmatpush1.bf16.msra.mxu0 %v2698_v19  ;;  %1492 = vmatprep.subr.bf16.mxu1 %v2697_v20  ;;  %v2751_v19 = vld [vmem:[#allocation6 + $0x44c] ss:$16 sps:$4 sm:$0xff]   ;;  %v2827_v20 = vld [vmem:[#allocation8 + $0xb0] ss:$8 sps:$4 sm:$0xff]  }
  0xbe   :  { %1440 = vmatprep.mubr.bf16.mxu0 %v2995_v23  ;;  %1522 = vmatprep.mubr.bf16.mxu1 %v3078_v53  ;;  %v2713_v53 = vld [vmem:[#allocation6 + $0x2c8] ss:$16 sps:$4 sm:$0xff]  }
  0xbf   :  { %2025 = vmatprep.subr.bf16.mxu0 %v2796_v35  ;;  %v2767_v35 = vld [vmem:[#allocation6 + $0x508] ss:$16 sps:$4 sm:$0xff]  }
  0xc0   :  { %1493 = vmatpush1.bf16.msra.mxu1 %v2695_v21  ;;  %v2832_v21 = vld [vmem:[#allocation8 + $0xc4] ss:$8 sps:$4 sm:$0xff]  }
  0xc1   :  { %1494 = vmatprep.subr.bf16.mxu1 %v2703_v22  ;;  %v2749_v22 = vld [vmem:[#allocation6 + $0x448] ss:$16 sps:$4 sm:$0xff]  }
  0xc4   :  { %1495 = vmatpush1.bf16.msra.mxu1 %v2701_v24  ;;  %v2754_v24 = vld [vmem:[#allocation6 + $0x46c] ss:$16 sps:$4 sm:$0xff]  }
  0xc5   :  { %1496 = vmatprep.subr.bf16.mxu1 %v2706_v26  ;;  %v2835_v26 = vld [vmem:[#allocation8 + $0xd4] ss:$8 sps:$4 sm:$0xff]  }
  0xc8   :  { %2390 = vmatmul.mubr.msk.bf16.vlgmr.msra.gmra.mrb[0].mxu0 %vm1281_vm0, %v3098_v28  ;;  %1497 = vmatpush1.bf16.msra.mxu1 %v2704_v27  ;;  %v2757_v27 = vld [vmem:[#allocation6 + $0x48c] ss:$16 sps:$4 sm:$0xff]  }
  0xc9   :  { %1498 = vmatprep.subr.bf16.mxu1 %v2709_v29  ;;  %2026 = vmatpush1.bf16.msra.mxu0 %v2794_v34  ;;  %v2755_v29 = vld [vmem:[#allocation6 + $0x488] ss:$16 sps:$4 sm:$0xff]   ;;  %v2769_v34 = vld [vmem:[#allocation6 + $0x50c] ss:$16 sps:$4 sm:$0xff]  }
  0xca   :  { %2027 = vmatprep.subr.bf16.mxu0 %v2799_v37  ;;  %v2772_v37 = vld [vmem:[#allocation6 + $0x52c] ss:$16 sps:$4 sm:$0xff]  }
  0xcc   :  { %1499 = vmatpush1.bf16.msra.mxu1 %v2707_v9  ;;  %v2760_v9 = vld [vmem:[#allocation6 + $0x4ac] ss:$16 sps:$4 sm:$0xff]  }
  0xcd   :  { %1500 = vmatprep.subr.bf16.mxu1 %v2712_v30  ;;  %2028 = vmatpush1.bf16.msra.mxu0 %v2797_v39  ;;  %v2758_v30 = vld [vmem:[#allocation6 + $0x4a8] ss:$16 sps:$4 sm:$0xff]  }
  0xce   :  { %2029 = vmatprep.subr.bf16.mxu0 %v2802_v41  ;;  %v2836_v39 = vld [vmem:[#allocation8 + $0xe0] ss:$8 sps:$4 sm:$0xff]   ;;  %v2775_v41 = vld [vmem:[#allocation6 + $0x54c] ss:$16 sps:$4 sm:$0xff]  }
  0xd0   :  { %1501 = vmatpush1.bf16.msra.mxu1 %v2710_v31  ;;  %v2763_v31 = vld [vmem:[#allocation6 + $0x4cc] ss:$16 sps:$4 sm:$0xff]  }
  0xd1   :  { %1502 = vmatprep.subr.bf16.mxu1 %v2715_v32  ;;  %2030 = vmatpush1.bf16.msra.mxu0 %v2800_v43  ;;  %v2761_v32 = vld [vmem:[#allocation6 + $0x4c8] ss:$16 sps:$4 sm:$0xff]  }
  0xd2   :  { %2031 = vmatprep.subr.bf16.mxu0 %v2805_v45  ;;  %v2839_v43 = vld [vmem:[#allocation8 + $0xf0] ss:$8 sps:$4 sm:$0xff]   ;;  %v2778_v45 = vld [vmem:[#allocation6 + $0x56c] ss:$16 sps:$4 sm:$0xff]  }
  0xd4   :  { %1503 = vmatpush1.bf16.msra.mxu1 %v2713_v53  ;;  %v2766_v53 = vld [vmem:[#allocation6 + $0x4ec] ss:$16 sps:$4 sm:$0xff]  }
  0xd5   :  { %1504 = vmatprep.subr.bf16.mxu1 %v2718_v33  ;;  %2032 = vmatpush1.bf16.msra.mxu0 %v2803_v47  ;;  %v2764_v33 = vld [vmem:[#allocation6 + $0x4e8] ss:$16 sps:$4 sm:$0xff]   ;;  %v2844_v47 = vld [vmem:[#allocation8 + $0x104] ss:$8 sps:$4 sm:$0xff]  }
  0xd6   :  { %2033 = vmatprep.subr.bf16.mxu0 %v2808_v49  ;;  %v2779_v49 = vld [vmem:[#allocation6 + $0x588] ss:$16 sps:$4 sm:$0xff]  }
  0xd8   :  { %1505 = vmatpush1.bf16.msra.mxu1 %v2716_v38  ;;  %v2838_v38 = vld [vmem:[#allocation8 + $0xe4] ss:$8 sps:$4 sm:$0xff]  }
  0xd9   :  { %1506 = vmatprep.subr.bf16.mxu1 %v2721_v40  ;;  %2034 = vmatpush1.bf16.msra.mxu0 %v2806_v51  ;;  %v2770_v40 = vld [vmem:[#allocation6 + $0x528] ss:$16 sps:$4 sm:$0xff]  }
  0xda   :  { %2035 = vmatprep.subr.bf16.mxu0 %v2811_v54  ;;  %v2782_v51 = vld [vmem:[#allocation6 + $0x5a8] ss:$16 sps:$4 sm:$0xff]  }
  0xdb   :  { %v2785_v54 = vld [vmem:[#allocation6 + $0x5c8] ss:$16 sps:$4 sm:$0xff]  }
  0xdc   :  { %1507 = vmatpush1.bf16.msra.mxu1 %v2719_v42  ;;  %v2841_v42 = vld [vmem:[#allocation8 + $0xf4] ss:$8 sps:$4 sm:$0xff]  }
  0xdd   :  { %1508 = vmatprep.subr.bf16.mxu1 %v2724_v44  ;;  %2036 = vmatpush1.bf16.msra.mxu0 %v2809_v56  ;;  %v2773_v44 = vld [vmem:[#allocation6 + $0x548] ss:$16 sps:$4 sm:$0xff]  }
  0xde   :  { %2037 = vmatprep.subr.bf16.mxu0 %v2814_v58  ;;  %v2788_v56 = vld [vmem:[#allocation6 + $0x5e8] ss:$16 sps:$4 sm:$0xff]  }
  0xdf   :  { %v2791_v58 = vld [vmem:[#allocation6 + $0x608] ss:$16 sps:$4 sm:$0xff]  }
  0xe0   :  { %1509 = vmatpush1.bf16.msra.mxu1 %v2722_v46  ;;  %v2776_v46 = vld [vmem:[#allocation6 + $0x568] ss:$16 sps:$4 sm:$0xff]  }
  0xe1   :  { %1510 = vmatprep.subr.bf16.mxu1 %v2727_v48  ;;  %2038 = vmatpush1.bf16.msra.mxu0 %v2812_v60  ;;  %v2781_v48 = vld [vmem:[#allocation6 + $0x58c] ss:$16 sps:$4 sm:$0xff]  }
  0xe2   :  { %2039 = vmatprep.subr.bf16.mxu0 %v2817_v62 }
  0xe4   :  { %1511 = vmatpush1.bf16.msra.mxu1 %v2725_v50  ;;  %v2784_v50 = vld [vmem:[#allocation6 + $0x5ac] ss:$16 sps:$4 sm:$0xff]  }
  0xe5   :  { %1512 = vmatprep.subr.bf16.mxu1 %v2730_v52  ;;  %2040 = vmatpush1.bf16.msra.mxu0 %v2815_v0  ;;  %v2787_v52 = vld [vmem:[#allocation6 + $0x5cc] ss:$16 sps:$4 sm:$0xff]  }
  0xe6   :  { %2041 = vmatprep.subr.bf16.mxu0 %v2820_v2 }
  0xe8   :  { %1513 = vmatpush1.bf16.msra.mxu1 %v2728_v55  ;;  %v2790_v55 = vld [vmem:[#allocation6 + $0x5ec] ss:$16 sps:$4 sm:$0xff]  }
  0xe9   :  { %1514 = vmatprep.subr.bf16.mxu1 %v2733_v57  ;;  %2042 = vmatpush1.bf16.msra.mxu0 %v2818_v4  ;;  %v2793_v57 = vld [vmem:[#allocation6 + $0x60c] ss:$16 sps:$4 sm:$0xff]  }
  0xea   :  { %2043 = vmatprep.subr.bf16.mxu0 %v2823_v6 }
  0xec   :  { %1515 = vmatpush1.bf16.msra.mxu1 %v2731_v59 }
  0xed   :  { %1516 = vmatprep.subr.bf16.mxu1 %v2736_v61  ;;  %2044 = vmatpush1.bf16.msra.mxu0 %v2821_v8 }
  0xee   :  { %2045 = vmatprep.subr.bf16.mxu0 %v2826_v11 }
  0xf0   :  { %1517 = vmatpush1.bf16.msra.mxu1 %v2734_v63  ;;  %v281_v63 = vlaneseq }
  0xf1   :  { %1518 = vmatprep.subr.bf16.mxu1 %v2739_v1  ;;  %2046 = vmatpush1.bf16.msra.mxu0 %v2824_v15 }
  0xf2   :  { %2047 = vmatprep.subr.bf16.mxu0 %v2829_v16  ;;  %v3108_v0 = vshrl.u32 %v281_v63, 7 }
  0xf4   :  { %1519 = vmatpush1.bf16.msra.mxu1 %v2737_v3  ;;  %v3111_v1 = vsub.s32 0, %v3108_v0 }
  0xf5   :  { %1520 = vmatprep.subr.bf16.mxu1 %v2742_v5  ;;  %2048 = vmatpush1.bf16.msra.mxu0 %v2827_v20 }
  0xf6   :  { %2049 = vmatprep.subr.bf16.mxu0 %v2832_v21  ;;  %v2847_v21 = vld [vmem:[#allocation8 + $0x114] ss:$8 sps:$4 sm:$0xff]  }
  0xf8   :  { %1521 = vmatpush1.bf16.msra.mxu1 %v2740_v7 }
  0xf9   :  { %1531 = vmatprep.subr.bf16.mxu1 %v2745_v10  ;;  %2050 = vmatpush1.bf16.msra.mxu0 %v2830_v25  ;;  %v2848_v25 = vld [vmem:[#allocation8 + $0x120] ss:$8 sps:$4 sm:$0xff]  }
  0xfa   :  { %2051 = vmatprep.subr.bf16.mxu0 %v2835_v26  ;;  %v2853_v26 = vld [vmem:[#allocation8 + $0x134] ss:$8 sps:$4 sm:$0xff]  }
  0xfb   :  { %1523 = vmatmul.mubr.bf16.vlgmr.msra.gmra.mrb[4].mxu1 %v3084_v12  ;;  %v2752_v12 = vld [vmem:[#allocation6 + $0x468] ss:$16 sps:$4 sm:$0xff]  }
  0xfc   :  { %1532 = vmatpush1.bf16.msra.mxu1 %v2743_v13  ;;  %1563 = vmatprep.mubr.bf16.mxu1 %v3089_v36  ;;  %v2833_v36 = vld [vmem:[#allocation8 + $0xd0] ss:$8 sps:$4 sm:$0xff]  }
  0xfd   :  { %1533 = vmatprep.subr.bf16.mxu1 %v2748_v14  ;;  %2052 = vmatpush1.bf16.msra.mxu0 %v2833_v36  ;;  %v2854_v36 = vld [vmem:[#allocation8 + $0x140] ss:$8 sps:$4 sm:$0xff]  }
  0xfe   :  { %2053 = vmatprep.subr.bf16.mxu0 %v2838_v38  ;;  %v2874_v38 = vld [vmem:[#allocation8 + $0x1a4] ss:$8 sps:$4 sm:$0xff]  }
 0x100   :  { %1534 = vmatpush1.bf16.msra.mxu1 %v2746_v18 }
 0x101   :  { %1535 = vmatprep.subr.bf16.mxu1 %v2751_v19  ;;  %2054 = vmatpush1.bf16.msra.mxu0 %v2836_v39  ;;  %v2842_v19 = vld [vmem:[#allocation8 + $0x100] ss:$8 sps:$4 sm:$0xff]  }
 0x102   :  { %2055 = vmatprep.subr.bf16.mxu0 %v2841_v42  ;;  %v2872_v39 = vld [vmem:[#allocation8 + $0x1a0] ss:$8 sps:$4 sm:$0xff]   ;;  %v2880_v42 = vld [vmem:[#allocation8 + $0x1c4] ss:$8 sps:$4 sm:$0xff]  }
 0x104   :  { %1536 = vmatpush1.bf16.msra.mxu1 %v2749_v22  ;;  %v2845_v22 = vld [vmem:[#allocation8 + $0x110] ss:$8 sps:$4 sm:$0xff]  }
 0x105   :  { %1537 = vmatprep.subr.bf16.mxu1 %v2754_v24  ;;  %2056 = vmatpush1.bf16.msra.mxu0 %v2839_v43  ;;  %v2850_v24 = vld [vmem:[#allocation8 + $0x124] ss:$8 sps:$4 sm:$0xff]   ;;  %v2878_v43 = vld [vmem:[#allocation8 + $0x1c0] ss:$8 sps:$4 sm:$0xff]  }
 0x106   :  { %2066 = vmatprep.subr.bf16.mxu0 %v2844_v47  ;;  %v2884_v47 = vld [vmem:[#allocation8 + $0x1e0] ss:$8 sps:$4 sm:$0xff]  }
 0x108   :  { %1538 = vmatpush1.bf16.msra.mxu1 %v2752_v12  ;;  %v2851_v12 = vld [vmem:[#allocation8 + $0x130] ss:$8 sps:$4 sm:$0xff]  }
 0x109   :  { %1539 = vmatprep.subr.bf16.mxu1 %v2757_v27  ;;  %v2856_v27 = vld [vmem:[#allocation8 + $0x144] ss:$8 sps:$4 sm:$0xff]  }
 0x10c   :  { %1540 = vmatpush1.bf16.msra.mxu1 %v2755_v29  ;;  %v2859_v29 = vld [vmem:[#allocation8 + $0x154] ss:$8 sps:$4 sm:$0xff]  }
 0x10d   :  { %1541 = vmatprep.subr.bf16.mxu1 %v2760_v9  ;;  %v2857_v9 = vld [vmem:[#allocation8 + $0x150] ss:$8 sps:$4 sm:$0xff]  }
 0x110   :  { %1542 = vmatpush1.bf16.msra.mxu1 %v2758_v30  ;;  %v2862_v30 = vld [vmem:[#allocation8 + $0x164] ss:$8 sps:$4 sm:$0xff]  }
 0x111   :  { %1543 = vmatprep.subr.bf16.mxu1 %v2763_v31  ;;  %v2860_v31 = vld [vmem:[#allocation8 + $0x160] ss:$8 sps:$4 sm:$0xff]  }
 0x114   :  { %1544 = vmatpush1.bf16.msra.mxu1 %v2761_v32  ;;  %v2865_v32 = vld [vmem:[#allocation8 + $0x174] ss:$8 sps:$4 sm:$0xff]  }
 0x115   :  { %1545 = vmatprep.subr.bf16.mxu1 %v2766_v53  ;;  %v2863_v53 = vld [vmem:[#allocation8 + $0x170] ss:$8 sps:$4 sm:$0xff]  }
 0x118   :  { %1546 = vmatpush1.bf16.msra.mxu1 %v2764_v33  ;;  %v2868_v33 = vld [vmem:[#allocation8 + $0x184] ss:$8 sps:$4 sm:$0xff]  }
 0x119   :  { %1547 = vmatprep.subr.bf16.mxu1 %v2769_v34  ;;  %v2866_v34 = vld [vmem:[#allocation8 + $0x180] ss:$8 sps:$4 sm:$0xff]  }
 0x11c   :  { %1548 = vmatpush1.bf16.msra.mxu1 %v2767_v35  ;;  %v2871_v35 = vld [vmem:[#allocation8 + $0x194] ss:$8 sps:$4 sm:$0xff]  }
 0x11d   :  { %1549 = vmatprep.subr.bf16.mxu1 %v2772_v37  ;;  %v2869_v37 = vld [vmem:[#allocation8 + $0x190] ss:$8 sps:$4 sm:$0xff]  }
 0x120   :  { %1550 = vmatpush1.bf16.msra.mxu1 %v2770_v40  ;;  %v2877_v40 = vld [vmem:[#allocation8 + $0x1b4] ss:$8 sps:$4 sm:$0xff]  }
 0x121   :  { %1551 = vmatprep.subr.bf16.mxu1 %v2775_v41  ;;  %v2875_v41 = vld [vmem:[#allocation8 + $0x1b0] ss:$8 sps:$4 sm:$0xff]  }
 0x124   :  { %1552 = vmatpush1.bf16.msra.mxu1 %v2773_v44  ;;  %v2883_v44 = vld [vmem:[#allocation8 + $0x1d4] ss:$8 sps:$4 sm:$0xff]  }
 0x125   :  { %1553 = vmatprep.subr.bf16.mxu1 %v2778_v45  ;;  %v2881_v45 = vld [vmem:[#allocation8 + $0x1d0] ss:$8 sps:$4 sm:$0xff]  }
 0x128   :  { %1554 = vmatpush1.bf16.msra.mxu1 %v2776_v46  ;;  %v2886_v46 = vld [vmem:[#allocation8 + $0x1e4] ss:$8 sps:$4 sm:$0xff]  }
 0x129   :  { %1555 = vmatprep.subr.bf16.mxu1 %v2781_v48  ;;  %v2889_v48 = vld [vmem:[#allocation8 + $0x1f4] ss:$8 sps:$4 sm:$0xff]  }
 0x12c   :  { %1556 = vmatpush1.bf16.msra.mxu1 %v2779_v49  ;;  %v2887_v49 = vld [vmem:[#allocation8 + $0x1f0] ss:$8 sps:$4 sm:$0xff]  }
 0x12d   :  { %1557 = vmatprep.subr.bf16.mxu1 %v2784_v50  ;;  %v291_v50 = vsub.s32 2, %v3108_v0 }
 0x130   :  { %1558 = vmatpush1.bf16.msra.mxu1 %v2782_v51  ;;  %v295_v51 = vsub.s32 3, %v3108_v0 }
 0x131   :  { %1559 = vmatprep.subr.bf16.mxu1 %v2787_v52 }
 0x134   :  { %1560 = vmatpush1.bf16.msra.mxu1 %v2785_v54 }
 0x135   :  { %1561 = vmatprep.subr.bf16.mxu1 %v2790_v55 }
 0x138   :  { %1562 = vmatpush1.bf16.msra.mxu1 %v2788_v56 }
 0x139   :  { %1572 = vmatprep.subr.bf16.mxu1 %v2793_v57 }
 0x13b   :  { %1564 = vmatmul.mubr.bf16.vlgmr.msra.gmra.mrb[4].mxu1 %v3092_v17  ;;  %v3116_v17 = vld [vmem:[%s3153_s2] sm:$0xf] }
 0x13c   :  { %1573 = vmatpush1.bf16.msra.mxu1 %v2791_v58  ;;  %1604 = vmatprep.mubr.bf16.mxu1 %v2995_v23  ;;  %v3119_v23 = vsub.s32 1, %v3108_v0  ;;  %v292_v52 = vrot.slane %v3116_v17, %v291_v50  ;;  %v296_v54 = vrot.slane %v3116_v17, %v295_v51  ;;  %v1693_v0 = vld [vmem:[%s3155_s4] sm:$0x3]  ;;  %s2996_s4 = smov [#allocation9]  }
 0x13e   :  { %v288_v2 = vrot.slane %v3116_v17, %v3119_v23 }
 0x147   :  { %2391 = vmatmul.mubr.msk.bf16.vlgmr.msra.gmra.mrb[4].mxu1 %vm1281_vm0, %v3098_v28  ;;  %v284_v28 = vrot.slane %v3116_v17, %v3111_v1  ;;  %v1698_v17 = vrot.slane %v1693_v0, %v3111_v1 }
 0x14e   :  { %v1319_v59 = vpop.f32.mrb[0].mxu1 }
 0x14f   :  { %v1321_v60 = vpop.f32.mrb[1].mxu1  ;;  %v1320_v3 = vadd.f32 %v1319_v59, %v284_v28 }
 0x150   :  { %v1323_v61 = vpop.f32.mrb[2].mxu1  ;;  %v1322_v4 = vadd.f32 %v1321_v60, %v288_v2 }
 0x151   :  { %v1324_v62 = vpop.f32.mrb[3].mxu1 }
 0x19b   :  { %v1442_v5 = vpop.f32.mrb[0].mxu0 }
 0x19c   :  { %v2459_v6 = vadd.f32 %v1442_v5, %v1320_v3  ;;  %v1444_v7 = vpop.f32.mrb[1].mxu0  ;;  %v2113_v5 = vld [vmem:[%s3156_s5] sm:$0x3]  ;;  %s2184_s5 = sshll.u32 %s2996_s4, 4  ;;  %s2185_s5 = int_to_ptr.vmem [resolvable:$true] %s2184_s5 }
 0x19d   :  { %v2461_v8 = vadd.f32 %v1444_v7, %v1322_v4  ;;  %v1446_v10 = vpop.f32.mrb[2].mxu0  ;;  %v1702_v4 = vrot.slane %v1693_v0, %v3119_v23  ;;  %s2960_s20 = scalar_lea.vmem %s2185_s5, 16  ;;  %s2964_s21 = scalar_lea.vmem %s2185_s5, 32 }
 0x19e   :  { %vm1613_vm1 = vcmp.gt.f32.partialorder %v2459_v6, 0.0  ;;  %v1617_v11 = vmul.f32 0.2, %v2459_v6  ;;  %v1447_v13 = vpop.f32.mrb[3].mxu0  ;;  %p2961_p10 = scmp.ne.s32.totalorder %s2185_s5, %s2960_s20  ;;  %p2965_p11 = scmp.lt.s32.totalorder %s2185_s5, %s2185_s5 }
 0x19f   :  { %vm1614_vm2 = vcmp.gt.f32.partialorder %v2461_v8, 0.0  ;;  %v1618_v14 = vmul.f32 0.2, %v2461_v8  ;;  %v2118_v13 = vrot.slane %v2113_v5, %v3111_v1  ;;  %p2966_p12 = scmp.lt.s32.totalorder %s2964_s21, %s2960_s20 }
 0x1a0   :  { %v1621_v15 = vsel %vm1613_vm1, %v2459_v6, %v1617_v11 }
 0x1a1   :  { %v1622_v16 = vsel %vm1614_vm2, %v2461_v8, %v1618_v14  ;;  %v1625_v20 = vpack.c.bf16 %v1621_v15, %v1621_v15  ;;  %p2967_p13 = por %p2966_p12, %p2965_p11 }
 0x1a2   :  { %v1626_v18 = vpack.c.bf16 %v1622_v16, %v1622_v16  ;;  %v2122_v16 = vrot.slane %v2113_v5, %v3119_v23 }
 0x1a3   :  { %p2968_p0 = pnand %p2967_p13, %p2961_p10 }
 0x1a4   :  { %2057 = vmatprep.mubr.bf16.mxu0 %v1626_v18 }
 0x1a5   :  { %2058 = vmatmul.mubr.bf16.vlgmr.msra.gmra.mrb[4].mxu0 %v1625_v20 }
 0x1a6   :  { %2067 = vmatpush1.bf16.msra.mxu0 %v2842_v19 }
 0x1a7   :  { %2068 = vmatprep.subr.bf16.mxu0 %v2847_v21 }
 0x1aa   :  { %2069 = vmatpush1.bf16.msra.mxu0 %v2845_v22 }
 0x1ab   :  { %2070 = vmatprep.subr.bf16.mxu0 %v2850_v24 }
 0x1ae   :  { %2071 = vmatpush1.bf16.msra.mxu0 %v2848_v25  ;;  %v2456_v25 = vld [vmem:[#allocation2] ss:$0 sm:$0xff] }
 0x1af   :  { %2072 = vmatprep.subr.bf16.mxu0 %v2853_v26 }
 0x1b2   :  { %2073 = vmatpush1.bf16.msra.mxu0 %v2851_v12 }
 0x1b3   :  { %2074 = vmatprep.subr.bf16.mxu0 %v2856_v27 }
 0x1b6   :  { %2075 = vmatpush1.bf16.msra.mxu0 %v2854_v36 }
 0x1b7   :  { %2076 = vmatprep.subr.bf16.mxu0 %v2859_v29 }
 0x1ba   :  { %2077 = vmatpush1.bf16.msra.mxu0 %v2857_v9 }
 0x1bb   :  { %2078 = vmatprep.subr.bf16.mxu0 %v2862_v30 }
 0x1be   :  { %2079 = vmatpush1.bf16.msra.mxu0 %v2860_v31 }
 0x1bf   :  { %2080 = vmatprep.subr.bf16.mxu0 %v2865_v32 }
 0x1c2   :  { %2081 = vmatpush1.bf16.msra.mxu0 %v2863_v53 }
 0x1c3   :  { %2082 = vmatprep.subr.bf16.mxu0 %v2868_v33 }
 0x1c6   :  { %2083 = vmatpush1.bf16.msra.mxu0 %v2866_v34 }
 0x1c7   :  { %2084 = vmatprep.subr.bf16.mxu0 %v2871_v35 }
 0x1ca   :  { %2085 = vmatpush1.bf16.msra.mxu0 %v2869_v37 }
 0x1cb   :  { %2086 = vmatprep.subr.bf16.mxu0 %v2874_v38 }
 0x1ce   :  { %2087 = vmatpush1.bf16.msra.mxu0 %v2872_v39 }
 0x1cf   :  { %2088 = vmatprep.subr.bf16.mxu0 %v2877_v40 }
 0x1d2   :  { %2089 = vmatpush1.bf16.msra.mxu0 %v2875_v41 }
 0x1d3   :  { %2090 = vmatprep.subr.bf16.mxu0 %v2880_v42 }
 0x1d6   :  { %2091 = vmatpush1.bf16.msra.mxu0 %v2878_v43 }
 0x1d7   :  { %2092 = vmatprep.subr.bf16.mxu0 %v2883_v44 }
 0x1da   :  { %2093 = vmatpush1.bf16.msra.mxu0 %v2881_v45 }
 0x1db   :  { %2094 = vmatprep.subr.bf16.mxu0 %v2886_v46 }
 0x1de   :  { %2095 = vmatpush1.bf16.msra.mxu0 %v2884_v47 }
 0x1df   :  { %2096 = vmatprep.subr.bf16.mxu0 %v2889_v48 }
 0x1e2   :  { %2097 = vmatpush1.bf16.msra.mxu0 %v2887_v49 }
 0x21a   :  { %v1606_v55 = vpop.f32.mrb[4].mxu1 }
 0x21b   :  { %v2462_v56 = vadd.f32 %v1606_v55, %v292_v52  ;;  %v1608_v57 = vpop.f32.mrb[5].mxu1 }
 0x21c   :  { %v2463_v58 = vadd.f32 %v1608_v57, %v296_v54  ;;  %v1610_v59 = vpop.f32.mrb[6].mxu1 }
 0x21d   :  { %vm1615_vm3 = vcmp.gt.f32.partialorder %v2462_v56, 0.0  ;;  %v1619_v60 = vmul.f32 0.2, %v2462_v56  ;;  %v1611_v61 = vpop.f32.mrb[7].mxu1 }
 0x21e   :  { %vm1616_vm4 = vcmp.gt.f32.partialorder %v2463_v58, 0.0  ;;  %v1620_v62 = vmul.f32 0.2, %v2463_v58 }
 0x21f   :  { %v1623_v63 = vsel %vm1615_vm3, %v2462_v56, %v1619_v60 }
 0x220   :  { %v1624_v28 = vsel %vm1616_vm4, %v2463_v58, %v1620_v62  ;;  %v1627_v3 = vpack.c.bf16 %v1623_v63, %v1623_v63 }
 0x221   :  { %v1628_v2 = vpack.c.bf16 %v1624_v28, %v1624_v28 }
 0x223   :  { %2098 = vmatprep.mubr.bf16.mxu0 %v1628_v2 }
 0x224   :  { %2099 = vmatmul.mubr.bf16.vlgmr.msra.gmra.mrb[4].mxu0 %v1627_v3 }
 0x2f7   :  { %v2100_v6 = vpop.f32.mrb[4].mxu0 }
 0x2f8   :  { %v2464_v7 = vadd.f32 %v2100_v6, %v1698_v17  ;;  %v2102_v8 = vpop.f32.mrb[5].mxu0 }
 0x2f9   :  { %v2465_v10 = vadd.f32 %v2102_v8, %v1702_v4  ;;  %v2104_v11 = vpop.f32.mrb[6].mxu0 }
 0x2fa   :  { %vm2107_vm5 = vcmp.gt.f32.partialorder %v2464_v7, 0.0  ;;  %v2109_v14 = vmul.f32 0.2, %v2464_v7  ;;  %v2105_v15 = vpop.f32.mrb[7].mxu0 }
 0x2fb   :  { %vm2108_vm6 = vcmp.gt.f32.partialorder %v2465_v10, 0.0  ;;  %v2110_v18 = vmul.f32 0.2, %v2465_v10 }
 0x2fc   :  { %v2111_v19 = vsel %vm2107_vm5, %v2464_v7, %v2109_v14 }
 0x2fd   :  { %v2112_v20 = vsel %vm2108_vm6, %v2465_v10, %v2110_v18  ;;  %v2125_v21 = vmul.f32 %v2118_v13, %v2111_v19 }
 0x2fe   :  { %v2126_v22 = vmul.f32 %v2122_v16, %v2112_v20 }
 0x300   :  { %v2127_v24 = vadd.f32 %v2126_v22, %v2125_v21 }
 0x302   :  { %2128 = vadd.xlane.f32.xlu0 %v2127_v24 }
 0x38f   :  { %v2129_v26 = vpop.xlane.xlu0 %2128 }
 0x390   :  { %v2137_v12 = vadd.f32 %v2456_v25, %v2129_v26 }
 0x392   :  { %2138 = vxpose.xlu0.b32.start.end [1/1] (short) (narrow) %v2137_v12, 8 }
 0x412   :  { %v2154_v27 = vpop.trf.xlu0 }
 0x413   :  { %v2457_v36 = vmul.f32 -1.442695, %v2154_v27 }
 0x415   :  { %2890 = vpow2.f32 %v2457_v36 }
 0x41f   :  { %v2891_v1 = vpop.eup %2890 }
 0x420   :  { %v2173_v29 = vadd.f32 1.0, %v2891_v1 }
 0x422   :  { %2892 = vrcp.f32 %v2173_v29 }
 0x42c   :  { %v2893_v23 = vpop.eup %2892 }
 0x42d   :  { %2177 = vst.msk [vmem:[#allocation9] sm:$0x1] %vm2176_vm7, %v2893_v23 }
 0x42e   :  { %2971 = shalt.err (!%p2968_p0)
}
 0x42f   :  { %s2972_s24 = scalar_lea.hbm %s3158_s7, 16 }
 0x430   :  { %p2973_p1 = scmp.ne.s32.totalorder %s3158_s7, %s2972_s24  ;;  %p2976_p2 = scmp.lt.u32.totalorder %s2972_s24, %s3158_s7 }
 0x432   :  { %p2978_p3 = pnand %p2976_p2, %p2973_p1 }
 0x434   :  { %2981 = shalt.err (!%p2978_p3)
}
 0x435   :  { %2187 = dma.vmem_to_hbm [thread:$0]  %s2185_s5, 16, %s3158_s7, [#allocation5]  }
 0x436   :  { %2986 = dma.done.wait [#allocation5], 16  }
 0x437   :  { %2987 = vsyncadd [#allocation5], 4294967280 }
 0x438   :  { %2191 = vsyncpa [#allocation4], 1 }
 0x439   :  { %2192 = vsyncpa [#allocation7], 1 }
 0x43a   :  { %2193 = vsyncpa [#allocation5], 1 }

</bundles_post_ra>
